<compile_context>
chip_gen: v6e
topology: v6e:2x2x1
jax: 0.10.0
libtpu: 0.0.40
codegen_flags: <defaults>
</compile_context>

<pallas_src>
import functools
import math

import jax
import jax.numpy as jnp
from jax.experimental import pallas as pl
from jax.experimental.pallas import tpu as pltpu


def _soft_argmax_kernel(x_ref, g_ref, o_ref, m_ref, l_ref, acc_ref, *, beta):
    # x_ref: (1, cb, tn)  g_ref: (1, tn, K)  o_ref: (1, cb, K)
    # scratch: m_ref (cb,1) f32, l_ref (cb,1) f32, acc_ref (cb,K) f32
    n = pl.program_id(2)

    @pl.when(n == 0)
    def _init():
        m_ref[...] = jnp.full_like(m_ref, -jnp.inf)
        l_ref[...] = jnp.zeros_like(l_ref)
        acc_ref[...] = jnp.zeros_like(acc_ref)

    # Online-softmax update for this voxel tile (all running stats in f32).
    z = beta * x_ref[0].astype(jnp.float32)                      # (cb, tn)
    m_prev = m_ref[...]                                          # (cb, 1)
    m_new = jnp.maximum(m_prev, jnp.max(z, axis=-1, keepdims=True))
    alpha = jnp.exp(m_prev - m_new)                              # (cb, 1) rescale
    e = jnp.exp(z - m_new)                                       # (cb, tn) unnormalized
    l_ref[...] = alpha * l_ref[...] + jnp.sum(e, axis=-1, keepdims=True)

    # Weighted sum over voxels on the MXU.  Keep grids in their native dtype
    # (bf16 if provided); only the MXU operand is downcast, accumulation is f32.
    g = g_ref[0]                                                 # (tn, K)
    acc_ref[...] = alpha * acc_ref[...] + jnp.dot(
        e.astype(g.dtype), g, preferred_element_type=jnp.float32)
    m_ref[...] = m_new

    @pl.when(n == pl.num_programs(2) - 1)
    def _finalize():
        # Deferred normalization: one reciprocal per channel on the (cb,K)
        # result instead of C*N per-element divides.
        inv_l = pl.reciprocal(l_ref[...], approx=True)           # (cb, 1)
        o_ref[0] = (acc_ref[...] * inv_l).astype(o_ref.dtype)


def _auto_n_block(n, cap=32768, align=128):
    """Largest multiple of 128 that divides n (<= cap); else full n."""
    if n <= align:
        return n
    best = 0
    t = align
    while t <= min(n, cap):
        if n % t == 0:
            best = t
        t += align
    return best if best else n


def _auto_c_block(c):
    """Small sublane-aligned channel tile (gives v7x a parallel axis); else full C."""
    return 8 if (c % 8 == 0) else c


def soft_argmax(x, grids, beta, *, n_block=None, c_block=None):
    """x: (B, C, *spatial); grids: (B, N, K) with N = prod(spatial) -> (B, C, K)."""
    B, C = x.shape[0], x.shape[1]
    N = math.prod(x.shape[2:])
    K = grids.shape[-1]
    assert grids.shape == (B, N, K), (grids.shape, (B, N, K))
    x_flat = x.reshape(B, C, N)

    tn = _auto_n_block(N) if n_block is None else n_block
    cb = _auto_c_block(C) if c_block is None else c_block
    assert N % tn == 0 and C % cb == 0, (N, tn, C, cb)
    c_tiles = C // cb
    n_tiles = N // tn

    itemsize = x_flat.dtype.itemsize
    cost = pl.CostEstimate(
        flops=2 * B * C * N * K,
        transcendentals=B * C * N,
        bytes_accessed=(B * C * N * itemsize                      # x read
                        + B * N * K * grids.dtype.itemsize * c_tiles  # grids re-read per C tile
                        + B * C * K * itemsize),                   # output write
    )

    kernel = functools.partial(_soft_argmax_kernel, beta=float(beta))
    return pl.pallas_call(
        kernel,
        out_shape=jax.ShapeDtypeStruct((B, C, K), x.dtype),
        grid_spec=pltpu.PrefetchScalarGridSpec(
            num_scalar_prefetch=0,
            grid=(B, c_tiles, n_tiles),
            in_specs=[
                pl.BlockSpec((1, cb, tn), lambda b, c, n: (b, c, n)),
                pl.BlockSpec((1, tn, K), lambda b, c, n: (b, n, 0)),
            ],
            # Output block is constant over the N axis -> stays resident; only
            # written in the finalize step.
            out_specs=pl.BlockSpec((1, cb, K), lambda b, c, n: (b, c, 0)),
            scratch_shapes=[
                pltpu.VMEM((cb, 1), jnp.float32),   # running max
                pltpu.VMEM((cb, 1), jnp.float32),   # running denominator
                pltpu.VMEM((cb, K), jnp.float32),   # running weighted sum
            ],
        ),
        compiler_params=pltpu.CompilerParams(
            dimension_semantics=("parallel", "parallel", "arbitrary"),
        ),
        cost_estimate=cost,
    )(x_flat, grids)


def soft_argmax_ref(x, grids, beta):
    B, C = x.shape[0], x.shape[1]
    xf = x.reshape(B, C, -1, 1)
    p = jax.nn.softmax(beta * xf, axis=2)
    g = grids[:, None, :, :]
    return jnp.sum(p * g, axis=2)


if __name__ == "__main__":
    # cfg.TRAIN.BETA — deterministic synthetic value
    BETA = 100.0
    K = 3

    key = jax.random.PRNGKey(0)
    kx1, kg1, kx2, kg2 = jax.random.split(key, 4)

    # Config 1: v2v-pose-like toy shape (B=2, C=4 joints, 8^3 volume -> N=512).
    # Force n_block=128 so the online-softmax accumulation runs across 4 N tiles.
    B, C, D = 2, 4, 8
    N = D * D * D
    x = jax.random.normal(kx1, (B, C, D, D, D), dtype=jnp.float32)
    grids = jax.random.uniform(kg1, (B, N, K), dtype=jnp.float32,
                               minval=-1.0, maxval=1.0)
    out = jax.block_until_ready(soft_argmax(x, grids, BETA, n_block=128))
    ref = soft_argmax_ref(x, grids, BETA)
    assert out.shape == (B, C, K)
    # approx EUP reciprocal in the finalize -> allow a small tolerance
    assert jnp.allclose(out, ref, atol=1e-2, rtol=1e-2), float(jnp.max(jnp.abs(out - ref)))

    # Config 2: exercises the channel-tiling ("parallel" C axis) path and a
    # smooth softmax (small beta) so the weighted-sum path is stressed too.
    B2, C2, D2 = 2, 16, 8
    N2 = D2 * D2 * D2
    x2 = jax.random.normal(kx2, (B2, C2, D2, D2, D2), dtype=jnp.float32)
    grids2 = jax.random.uniform(kg2, (B2, N2, K), dtype=jnp.float32,
                                minval=-1.0, maxval=1.0)
    out2 = jax.block_until_ready(soft_argmax(x2, grids2, 3.0, n_block=256, c_block=8))
    ref2 = soft_argmax_ref(x2, grids2, 3.0)
    assert out2.shape == (B2, C2, K)
    assert jnp.allclose(out2, ref2, atol=1e-2, rtol=1e-2), float(jnp.max(jnp.abs(out2 - ref2)))

    print("KERNEL_OK")
</pallas_src>

<mosaic_0001>
module attributes {stable_mosaic.version = 11 : i64} {
  func.func @_soft_argmax_kernel(%arg0: i32, %arg1: i32, %arg2: i32, %arg3: memref<1x4x128xf32, #tpu.memory_space<vmem>>, %arg4: memref<1x128x3xf32, #tpu.memory_space<vmem>>, %arg5: memref<1x4x3xf32, #tpu.memory_space<vmem>>, %arg6: memref<4x1xf32, #tpu.memory_space<vmem>>, %arg7: memref<4x1xf32, #tpu.memory_space<vmem>>, %arg8: memref<4x3xf32, #tpu.memory_space<vmem>>) attributes {dimension_semantics = [#tpu.dimension_semantics<parallel>, #tpu.dimension_semantics<parallel>, #tpu.dimension_semantics<arbitrary>], iteration_bounds = array<i64: 2, 1, 4>, scalar_prefetch = 0 : i64, scratch_operands = 3 : i64, tpu.core_type = #tpu.core_type<tc>, window_params = [{transform_indices = @transform_0, window_bounds = array<i64: 1, 4, 128>}, {transform_indices = @transform_1, window_bounds = array<i64: 1, 128, 3>}, {transform_indices = @transform_2, window_bounds = array<i64: 1, 4, 3>}]} {
    %c0_i32 = arith.constant 0 : i32
    %0 = arith.cmpi eq, %arg2, %c0_i32 : i32
    %1 = arith.extui %0 : i1 to i32
    %c0_i32_0 = arith.constant 0 : i32
    %2 = arith.cmpi ne, %1, %c0_i32_0 : i32
    scf.if %2 {
      %cst_22 = arith.constant 0xFF800000 : f32
      %34 = vector.broadcast %cst_22 : f32 to vector<4x1xf32>
      %c0_23 = arith.constant 0 : index
      %c0_24 = arith.constant 0 : index
      %35 = vector.load %arg6[%c0_23, %c0_24] : memref<4x1xf32, #tpu.memory_space<vmem>>, vector<4x1xf32>
      tpu.vector_store %arg6[%c0_23, %c0_24], %34 {strides = array<i32>} : memref<4x1xf32, #tpu.memory_space<vmem>>, vector<4x1xf32>,
      %cst_25 = arith.constant 0.000000e+00 : f32
      %36 = vector.broadcast %cst_25 : f32 to vector<4x1xf32>
      %c0_26 = arith.constant 0 : index
      %c0_27 = arith.constant 0 : index
      %37 = vector.load %arg7[%c0_26, %c0_27] : memref<4x1xf32, #tpu.memory_space<vmem>>, vector<4x1xf32>
      tpu.vector_store %arg7[%c0_26, %c0_27], %36 {strides = array<i32>} : memref<4x1xf32, #tpu.memory_space<vmem>>, vector<4x1xf32>,
      %cst_28 = arith.constant 0.000000e+00 : f32
      %38 = vector.broadcast %cst_28 : f32 to vector<4x3xf32>
      %c0_29 = arith.constant 0 : index
      %c0_30 = arith.constant 0 : index
      %39 = vector.load %arg8[%c0_29, %c0_30] : memref<4x3xf32, #tpu.memory_space<vmem>>, vector<4x3xf32>
      tpu.vector_store %arg8[%c0_29, %c0_30], %38 {strides = array<i32>} : memref<4x3xf32, #tpu.memory_space<vmem>>, vector<4x3xf32>,
    } else {
    }
    %c0 = arith.constant 0 : index
    %c0_1 = arith.constant 0 : index
    %c0_2 = arith.constant 0 : index
    %3 = vector.load %arg3[%c0, %c0_1, %c0_2] : memref<1x4x128xf32, #tpu.memory_space<vmem>>, vector<1x4x128xf32>
    %4 = vector.shape_cast %3 : vector<1x4x128xf32> to vector<4x128xf32>
    %cst = arith.constant 1.000000e+02 : f32
    %5 = vector.broadcast %cst : f32 to vector<4x128xf32>
    %6 = arith.mulf %5, %4 : vector<4x128xf32>
    %c0_3 = arith.constant 0 : index
    %c0_4 = arith.constant 0 : index
    %7 = vector.load %arg6[%c0_3, %c0_4] : memref<4x1xf32, #tpu.memory_space<vmem>>, vector<4x1xf32>
    %cst_5 = arith.constant dense<0xFF800000> : vector<4xf32>
    %8 = vector.multi_reduction <maximumf>, %6, %cst_5 [1] : vector<4x128xf32> to vector<4xf32>
    %9 = vector.shape_cast %8 : vector<4xf32> to vector<4x1xf32>
    %10 = arith.maximumf %7, %9 : vector<4x1xf32>
    %11 = arith.subf %7, %10 : vector<4x1xf32>
    %12 = math.exp %11 : vector<4x1xf32>
    %13 = vector.broadcast %10 : vector<4x1xf32> to vector<4x128xf32>
    %14 = arith.subf %6, %13 : vector<4x128xf32>
    %15 = math.exp %14 : vector<4x128xf32>
    %c0_6 = arith.constant 0 : index
    %c0_7 = arith.constant 0 : index
    %16 = vector.load %arg7[%c0_6, %c0_7] : memref<4x1xf32, #tpu.memory_space<vmem>>, vector<4x1xf32>
    %17 = arith.mulf %12, %16 : vector<4x1xf32>
    %cst_8 = arith.constant dense<0.000000e+00> : vector<4xf32>
    %18 = vector.multi_reduction <add>, %15, %cst_8 [1] : vector<4x128xf32> to vector<4xf32>
    %19 = vector.shape_cast %18 : vector<4xf32> to vector<4x1xf32>
    %20 = arith.addf %17, %19 : vector<4x1xf32>
    %c0_9 = arith.constant 0 : index
    %c0_10 = arith.constant 0 : index
    %21 = vector.load %arg7[%c0_9, %c0_10] : memref<4x1xf32, #tpu.memory_space<vmem>>, vector<4x1xf32>
    tpu.vector_store %arg7[%c0_9, %c0_10], %20 {strides = array<i32>} : memref<4x1xf32, #tpu.memory_space<vmem>>, vector<4x1xf32>,
    %c0_11 = arith.constant 0 : index
    %c0_12 = arith.constant 0 : index
    %c0_13 = arith.constant 0 : index
    %22 = vector.load %arg4[%c0_11, %c0_12, %c0_13] : memref<1x128x3xf32, #tpu.memory_space<vmem>>, vector<1x128x3xf32>
    %23 = vector.shape_cast %22 : vector<1x128x3xf32> to vector<128x3xf32>
    %c0_14 = arith.constant 0 : index
    %c0_15 = arith.constant 0 : index
    %24 = vector.load %arg8[%c0_14, %c0_15] : memref<4x3xf32, #tpu.memory_space<vmem>>, vector<4x3xf32>
    %25 = vector.broadcast %12 : vector<4x1xf32> to vector<4x3xf32>
    %26 = arith.mulf %25, %24 : vector<4x3xf32>
    %cst_16 = arith.constant dense<0.000000e+00> : vector<4x3xf32>
    %27 = tpu.matmul %15, %23, %cst_16 {dimension_numbers = #tpu.dot_dimension_numbers<[1], [0], [0], [1], [0, 0, 1, 1], [], []>} : vector<4x128xf32>, vector<128x3xf32>, vector<4x3xf32> -> vector<4x3xf32>
    %28 = arith.addf %26, %27 : vector<4x3xf32>
    %c0_17 = arith.constant 0 : index
    %c0_18 = arith.constant 0 : index
    %29 = vector.load %arg8[%c0_17, %c0_18] : memref<4x3xf32, #tpu.memory_space<vmem>>, vector<4x3xf32>
    tpu.vector_store %arg8[%c0_17, %c0_18], %28 {strides = array<i32>} : memref<4x3xf32, #tpu.memory_space<vmem>>, vector<4x3xf32>,
    %c0_19 = arith.constant 0 : index
    %c0_20 = arith.constant 0 : index
    %30 = vector.load %arg6[%c0_19, %c0_20] : memref<4x1xf32, #tpu.memory_space<vmem>>, vector<4x1xf32>
    tpu.vector_store %arg6[%c0_19, %c0_20], %10 {strides = array<i32>} : memref<4x1xf32, #tpu.memory_space<vmem>>, vector<4x1xf32>,
    %c3_i32 = arith.constant 3 : i32
    %31 = arith.cmpi eq, %arg2, %c3_i32 : i32
    %32 = arith.extui %31 : i1 to i32
    %c0_i32_21 = arith.constant 0 : i32
    %33 = arith.cmpi ne, %32, %c0_i32_21 : i32
    scf.if %33 {
      %c0_22 = arith.constant 0 : index
      %c0_23 = arith.constant 0 : index
      %34 = vector.load %arg7[%c0_22, %c0_23] : memref<4x1xf32, #tpu.memory_space<vmem>>, vector<4x1xf32>
      %35 = tpu.reciprocal %34 {approx = true} : vector<4x1xf32> -> vector<4x1xf32>
      %c0_24 = arith.constant 0 : index
      %c0_25 = arith.constant 0 : index
      %36 = vector.load %arg8[%c0_24, %c0_25] : memref<4x3xf32, #tpu.memory_space<vmem>>, vector<4x3xf32>
      %37 = vector.broadcast %35 : vector<4x1xf32> to vector<4x3xf32>
      %38 = arith.mulf %36, %37 : vector<4x3xf32>
      %c0_26 = arith.constant 0 : index
      %c0_27 = arith.constant 0 : index
      %c0_28 = arith.constant 0 : index
      %39 = vector.load %arg5[%c0_26, %c0_27, %c0_28] : memref<1x4x3xf32, #tpu.memory_space<vmem>>, vector<1x4x3xf32>
      %40 = vector.shape_cast %39 : vector<1x4x3xf32> to vector<4x3xf32>
      %41 = vector.shape_cast %38 : vector<4x3xf32> to vector<1x4x3xf32>
      tpu.vector_store %arg5[%c0_26, %c0_27, %c0_28], %41 {strides = array<i32>} : memref<1x4x3xf32, #tpu.memory_space<vmem>>, vector<1x4x3xf32>,
    } else {
    }
    return
  }
  func.func @transform_0(%arg0: i32, %arg1: i32, %arg2: i32) -> (i32, i32, i32) {
    %c0_i32 = arith.constant 0 : i32
    return %arg0, %arg1, %arg2 : i32, i32, i32
  }
  func.func @transform_1(%arg0: i32, %arg1: i32, %arg2: i32) -> (i32, i32, i32) {
    %c0_i32 = arith.constant 0 : i32
    %c0_i32_0 = arith.constant 0 : i32
    return %arg0, %arg2, %c0_i32 : i32, i32, i32
  }
  func.func @transform_2(%arg0: i32, %arg1: i32, %arg2: i32) -> (i32, i32, i32) {
    %c0_i32 = arith.constant 0 : i32
    %c0_i32_0 = arith.constant 0 : i32
    return %arg0, %arg1, %c0_i32 : i32, i32, i32
  }
}

</mosaic_0001>

<bundles_post_ra>
// kernel: tpu_custom_call.1
= control target key start
LH: loop header
LB: loop body
LE: loop exit
PB: predicated region body
PF: predicated region fallthrough
CT: control target
= control target key end

     0   :  { %s667_s9 = smov 0   ;;  %s669_s10 = smov 0   ;;  %s757_s0 = inlined_call_operand.vmem [shape: f32[2,4,512], index: 0, kind: input, shape index: {}]   ;;  %s758_s1 = inlined_call_operand.vmem [shape: f32[2,512,3], index: 1, kind: input, shape index: {}]   ;;  %s759_s2 = inlined_call_operand.vmem [shape: f32[2,4,3], index: 2, kind: output, shape index: {}]  }
   0x1   :  { %s671_s11 = smov 0   ;;  %s673_s12 = smov 0  }
   0x2   :  { %s675_s13 = smov 0  }
   0x3 LB: > { %s24_s14 = sadd.s32 1, %s636_s11  ;;  %s31_s15 = sadd.s32 1, %s640_s12  ;;  %s644_s13 = sphi %s675_s13, %s12_s13   ;;  %s640_s12 = sphi %s673_s12, %s763_s12   ;;  %s636_s11 = sphi %s671_s11, %s762_s11   ;;  %s632_s10 = sphi %s669_s10, %s761_s10   ;;  %s628_s9 = sphi %s667_s9, %s760_s9  }
   0x4   : > { %p25_p0 = scmp.ge.s32.totalorder %s24_s14, 4  ;;  %p488_p1 = scmp.ge.s32.totalorder %s644_s13, 1 }
   0x5   : > { %p161_p2 = scmp.lt.s32.totalorder %s644_s13, 9 }
   0x6   : > { %s765_s14 = smov (%p25_p0, %s24_s14), 0  ;;  %s767_s15 = smov (!%p25_p0, %s31_s15), %s640_s12 }
   0x7   : > { %p162_p3 = pnand %p488_p1, %p161_p2  ;;  %p33_p4 = scmp.ge.s32.totalorder %s767_s15, 2 }
   0x8   : > { %p201_p5 = scmp.lt.s32.totalorder (!%p162_p3), %s632_s10, 1  ;;  %p205_p6 = scmp.lt.s32.totalorder (!%p162_p3), %s628_s9, 3 }
   0x9   : > { %s769_s15 = smov (%p33_p4, %s767_s15), 0  ;;  %165 = sbr.rel (%p162_p3) target bundleno = 652 (0x28c), region = 28 }
   0xa   : > { %s491_s16 = sshll.u32 (!%p162_p3), %s628_s9, 4  ;;  %p495_p8 = scmp.ne.s32.totalorder (!%p162_p3), %s628_s9, 0 }
   0xb   : > { %p216_p7 = scmp.lt.s32.totalorder (!%p162_p3), %s491_s16, 63 }
   0xe   : > { %s771_s10 = smov (!%p201_p5, %s632_s10), 1  ;;  %s773_s16 = smov (!%p216_p7, %s491_s16), 63 }
   0xf   : > { %s206_s17 = scalar_select %p205_p6, %s628_s9, 3 }
  0x10   : > { %s489_s18 = sshll.u32 %s771_s10, 2  ;;  %s492_s27 = sshll.u32 %s771_s10, 6 }
  0x11   : > { %s210_s19 = sadd.s32 %s489_s18, %s206_s17  ;;  %s705_s23 = scalar_lea.vmem %s759_s2, %s489_s18 }
  0x12   : > { %s490_s20 = sshll.u32 %s210_s19, 2  ;;  %s219_s28 = sadd.s32 %s492_s27, %s773_s16 }
  0x13   : > { %s212_s26 = scalar_lea.vmem %s757_s0, %s490_s20  ;;  %s493_s29 = sshll.u32 %s219_s28, 3 }
  0x14   : > { %s713_s4 = scalar_lea.vmem %s758_s1, %s493_s29  ;;  %233 = sbr.rel (%p495_p8) target bundleno = 28 (0x1c), region = 32 }
  0x19   : > { %vm234_vm0 = vcmask 3072   ;;  %vm237_vm1 = vcmask 19456   ;;  %v646_v0 = vmov -inf   ;;  %v647_v1 = vmov 0.0  }
  0x1a   : > { %235 = vst.msk [vmem:[#allocation2] sm:$0xf] %vm234_vm0, %v646_v0  ;;  %236 = vst.msk [vmem:[#allocation3] sm:$0xf] %vm234_vm0, %v647_v1 }
  0x1b   : > { %238 = vst.msk [vmem:[#allocation4] sm:$0xf] %vm237_vm1, %v647_v1 }
  0x1c PF: > { %v239_v2 = vld [vmem:[%s212_s26] sm:$0xf]  ;;  %vm242_vm2 = vcmask 1043456   ;;  %v648_v5 = vmov 0   ;;  %v281_v6 = vld [vmem:[%s713_s4 + $0x78] sm:$0xff]  ;;  %v649_v7 = vmov 0.0  }
  0x1d   : > { %v716_v3 = vmul.f32 100.0, %v239_v2  ;;  %597 = vset.pattern.permute.xlu0 %v648_v5  ;;  %598 = vset.pattern.permute.xlu1 %v648_v5  ;;  %v280_v8 = vld [vmem:[%s713_s4 + $0x70] sm:$0xff]  ;;  %v279_v9 = vld [vmem:[%s713_s4 + $0x68] sm:$0xff]  ;;  %v278_v10 = vld [vmem:[%s713_s4 + $0x60] sm:$0xff]  ;;  %vm264_vm3 = vcmask 3072   ;;  %vm650_vm4 = vmmov 0  }
  0x1e   : > { %516 = vmatprep.subr.mxu0 %v649_v7  ;;  %v277_v11 = vld [vmem:[%s713_s4 + $0x58] sm:$0xff]  ;;  %v276_v12 = vld [vmem:[%s713_s4 + $0x50] sm:$0xff]  ;;  %v275_v13 = vld [vmem:[%s713_s4 + $0x48] sm:$0xff]  ;;  %548 = vmatprep.mubr.msk.f32.mxu0 %vm650_vm4, %v649_v7  ;;  %vm360_vm5 = vcmask 19456   ;;  %p496_p9 = scmp.ne.s32.totalorder %s628_s9, 3 }
  0x1f   : > { %v243_v4 = vsel %vm242_vm2, %v716_v3, -inf  ;;  %517 = vmatpush3.msra.mxu0 %v281_v6  ;;  %v274_v15 = vld [vmem:[%s713_s4 + $0x40] sm:$0xff]  ;;  %v273_v18 = vld [vmem:[%s713_s4 + $0x38] sm:$0xff]  ;;  %v272_v20 = vld [vmem:[%s713_s4 + $0x30] sm:$0xff] }
  0x20   : > { %244 = vmax.xlane.f32.xlu0 %v243_v4  ;;  %518 = vmatprep.subr.mxu0 %v649_v7  ;;  %v271_v21 = vld [vmem:[%s713_s4 + $0x28] sm:$0xff]  ;;  %v270_v22 = vld [vmem:[%s713_s4 + $0x20] sm:$0xff]  ;;  %v269_v23 = vld [vmem:[%s713_s4 + $0x18] sm:$0xff] }
  0x21   : > { %519 = vmatpush3.msra.mxu0 %v280_v8  ;;  %v241_v14 = vld [vmem:[#allocation2] sm:$0xf]  ;;  %v268_v24 = vld [vmem:[%s713_s4 + $0x10] sm:$0xff]  ;;  %v267_v25 = vld [vmem:[%s713_s4 + $0x8] sm:$0xff] }
  0x22   : > { %520 = vmatprep.subr.mxu0 %v649_v7  ;;  %v266_v26 = vld [vmem:[%s713_s4] sm:$0xff]  ;;  %v282_v38 = vld [vmem:[#allocation4] sm:$0xf] }
  0x23   : > { %521 = vmatpush3.msra.mxu0 %v279_v9  ;;  %v258_v34 = vld [vmem:[#allocation3] sm:$0xf] }
  0x24   : > { %522 = vmatprep.subr.mxu0 %v649_v7 }
  0x25   : > { %523 = vmatpush3.msra.mxu0 %v278_v10 }
  0x26   : > { %524 = vmatprep.subr.mxu0 %v649_v7 }
  0x27   : > { %525 = vmatpush3.msra.mxu0 %v277_v11 }
  0x28   : > { %526 = vmatprep.subr.mxu0 %v649_v7 }
  0x29   : > { %527 = vmatpush3.msra.mxu0 %v276_v12 }
  0x2a   : > { %528 = vmatprep.subr.mxu0 %v649_v7 }
  0x2b   : > { %529 = vmatpush3.msra.mxu0 %v275_v13 }
  0x2c   : > { %530 = vmatprep.subr.mxu0 %v649_v7 }
  0x2d   : > { %531 = vmatpush3.msra.mxu0 %v274_v15 }
  0x2e   : > { %532 = vmatprep.subr.mxu0 %v649_v7 }
  0x2f   : > { %533 = vmatpush3.msra.mxu0 %v273_v18 }
  0x30   : > { %534 = vmatprep.subr.mxu0 %v649_v7 }
  0x31   : > { %535 = vmatpush3.msra.mxu0 %v272_v20 }
  0x32   : > { %536 = vmatprep.subr.mxu0 %v649_v7 }
  0x33   : > { %537 = vmatpush3.msra.mxu0 %v271_v21 }
  0x34   : > { %538 = vmatprep.subr.mxu0 %v649_v7 }
  0x35   : > { %539 = vmatpush3.msra.mxu0 %v270_v22 }
  0x36   : > { %540 = vmatprep.subr.mxu0 %v649_v7 }
  0x37   : > { %541 = vmatpush3.msra.mxu0 %v269_v23 }
  0x38   : > { %542 = vmatprep.subr.mxu0 %v649_v7 }
  0x39   : > { %543 = vmatpush3.msra.mxu0 %v268_v24 }
  0x3a   : > { %544 = vmatprep.subr.mxu0 %v649_v7 }
  0x3b   : > { %545 = vmatpush3.msra.mxu0 %v267_v25 }
  0x3c   : > { %546 = vmatprep.subr.mxu0 %v649_v7 }
  0x3d   : > { %547 = vmatpush3.msra.mxu0 %v266_v26 }
  0xa9   : > { %v245_v16 = vpop.xlane.xlu0 %244 }
  0xaa   : > { %v246_v17 = vmax.f32 %v241_v14, %v245_v16 }
  0xac   : > { %v247_v19 = vsub.f32 %v241_v14, %v246_v17  ;;  %362 = vst.msk [vmem:[#allocation2] sm:$0xf] %vm264_vm3, %v246_v17  ;;  %252 = vperm.xlu0 %597, %v246_v17  }
  0xae   : > { %v248_v31 = vmul.f32 1.442695, %v247_v19 }
 0x127   : > { %v253_v27 = vpop.permute.xlu0 %252 }
 0x128   : > { %v255_v28 = vsub.f32 %v716_v3, %v253_v27 }
 0x12a   : > { %v256_v29 = vmul.f32 1.442695, %v255_v28 }
 0x12c   : > { %599 = vpow2.f32 %v256_v29 }
 0x12d   : > { %601 = vpow2.f32 %v248_v31 }
 0x139   : > { %v600_v30 = vpop.eup %599 }
 0x13a   : > { %549 = vmatmul.mubr.f32.vlgmr.msra.gmra.mxu0 %v600_v30  ;;  %v260_v32 = vsel %vm242_vm2, %v600_v30, 0.0  ;;  %v602_v33 = vpop.eup %601 }
 0x13b   : > { %261 = vadd.xlane.f32.xlu1 %v260_v32  ;;  %v259_v35 = vmul.f32 %v602_v33, %v258_v34 }
 0x14c   : > { %285 = vperm.xlu1 %598, %v602_v33  }
 0x1c4   : > { %v262_v36 = vpop.xlane.xlu1 %261 }
 0x1c5   : > { %v263_v37 = vadd.f32 %v262_v36, %v259_v35 }
 0x1c7   : > { %265 = vst.msk [vmem:[#allocation3] sm:$0xf] %vm264_vm3, %v263_v37 }
 0x1c8   : > { %v286_v39 = vpop.permute.xlu1 %285 }
 0x1c9   : > { %v288_v40 = vmul.f32 %v286_v39, %v282_v38 }
 0x1f9   : > { %366 = sbr.rel (%p496_p9) target bundleno = 652 (0x28c), region = 36 }
 0x1fa   : > { %v355_v41 = vpop.f32.mrf.mxu0 }
 0x1fb   : > { %v359_v42 = vadd.f32 %v355_v41, %v288_v40 }
 0x1fc   : > { %v550_v43 = vpop.f32.mrf.mxu0 }
 0x1fd   : > { %361 = vst.msk [vmem:[#allocation4] sm:$0xf] %vm360_vm5, %v359_v42 }
 0x1fe   : > { %v367_v44 = vld [vmem:[#allocation3] sm:$0xf]  ;;  %v651_v45 = vmov 0  }
 0x1ff   : > { %603 = vset.pattern.permute.xlu0 %v651_v45  ;;  %604 = vrcp.f32 %v367_v44 }
 0x204   : > { %v369_v47 = vld [vmem:[#allocation4] sm:$0xf] }
 0x20c   : > { %v605_v46 = vpop.eup %604 }
 0x20d   : > { %372 = vperm.xlu0 %603, %v605_v46  }
 0x288   : > { %v373_v48 = vpop.permute.xlu0 %372 }
 0x289   : > { %v375_v49 = vmul.f32 %v373_v48, %v369_v47 }
 0x28b   : > { %376 = vst.msk [vmem:[%s705_s23] sm:$0xf] %vm360_vm5, %v375_v49 }
 0x28c PF: > { %s12_s13 = sadd.s32 1, %s644_s13   ;;  %s760_s9 = smov %s636_s11 }
 0x28d   : > { %p9_p10 = scmp.ge.s32.totalorder %s12_s13, 10   ;;  %s761_s10 = smov %s640_s12 }
 0x28e   : > { %s762_s11 = smov %s765_s14  ;;  %s763_s12 = smov %s769_s15 }
 0x28f   :  { %11 = sbr.rel (!%p9_p10) target bundleno = 3 (0x3), region = 69 }

</bundles_post_ra>
